<compile_context>
chip_gen: v5e
topology: v5e:2x2
jax: 0.10.0
libtpu: 0.0.40
codegen_flags: <defaults>
</compile_context>

<pallas_src>
import jax
import jax.numpy as jnp
from jax.experimental import pallas as pl
from jax.experimental.pallas import tpu as pltpu

WEIGHT_CE = 1.0    # weight_ce
WEIGHT_DICE = 1.0  # weight_dice
SMOOTH = 1.0       # MemoryEfficientSoftDiceLoss default smooth


def _round_up(v, m):
    return ((v + m - 1) // m) * m


def _vmem_capacity_bytes():
    """Per-generation VMEM capacity; conservative fallback if query fails."""
    try:
        info = pltpu.get_tpu_info()
        cap = getattr(info, "vmem_capacity_bytes", None)
        if cap:
            return int(cap)
    except Exception:
        pass
    return 64 * 1024 * 1024  # v7x per-core VMEM: safe lower bound everywhere


def _pick_row_packing(bc, s, min_itemsize):
    """Split each (b,c) row into k sub-rows: (BC, S) -> (BC*k, S//k) so the
    sublane axis is dense (>=16 rows for sub-32-bit inputs, >=8 for f32)."""
    target = 32 if min_itemsize < 4 else 16
    k = 1
    while (bc * k) < target and (s % (2 * k) == 0) and (s // (2 * k)) >= 128:
        k *= 2
    while (bc * k) % 8 != 0 and (s % (2 * k) == 0) and (s // (2 * k)) >= 128:
        k *= 2
    return k


def bce_and_dice_loss(net_output, target):
    """net_output: [B, C, H, W] probabilities in (0,1); target: binary labels."""
    B, C, H, W = net_output.shape
    BC = B * C
    S = H * W

    x_bytes = jnp.dtype(net_output.dtype).itemsize
    y_bytes = jnp.dtype(target.dtype).itemsize

    # ---- layout: pack sublanes, optionally split rows across 2 cores -------
    k = _pick_row_packing(BC, S, min(x_bytes, y_bytes))
    R = BC * k
    SP = S // k                                   # spatial elements per row

    x = net_output.reshape(R, SP)
    y = target.reshape(R, SP)

    P = 1
    if BC * S >= (1 << 21) and R % 16 == 0:
        P = 2                                     # v7x: one row-group per TC
    RG = R // P

    # ---- spatial tile: large, byte-budgeted, but keep >= ~4 grid steps -----
    vmem_cap = _vmem_capacity_bytes()
    vmem_limit = min(int(vmem_cap * 3 // 4), 100 * 1024 * 1024)
    # 2x double-buffered inputs + ~5 live f32 tile-sized intermediates
    per_elem_vmem = 2 * (x_bytes + y_bytes) + 5 * 4
    max_tile_elems = max((vmem_limit // 2) // per_elem_vmem, 8 * 128)

    ts_cap = max((max_tile_elems // RG) // 128 * 128, 128)
    ts_overlap = _round_up(pl.cdiv(SP, 4), 128)   # keep ~4+ pipeline steps
    TS = max(128, min(ts_cap, ts_overlap))
    if TS >= SP:
        TS = SP                                   # single full-width block
    num_tiles = pl.cdiv(SP, TS)
    ragged = (SP % TS) != 0

    def kernel(x_ref, y_ref, log_out, int_out, den_out,
               log_acc, int_acc, den_acc):
        s = pl.program_id(1)
        last = pl.num_programs(1) - 1

        @pl.when(s == 0)
        def _init():
            log_acc[...] = jnp.zeros_like(log_acc)
            int_acc[...] = jnp.zeros_like(int_acc)
            den_acc[...] = jnp.zeros_like(den_acc)

        def accum(xt, yt):
            # Binary targets -> a single clamped log per element
            # (torch.nn.BCELoss clamps log at -100).
            p = jnp.where(yt > 0.5, xt, 1.0 - xt)
            logp = jnp.maximum(jnp.log(p), -100.0)
            log_acc[...] += jnp.sum(logp, axis=1, keepdims=True)      # (RG,1)
            int_acc[...] += jnp.sum(xt * yt, axis=1, keepdims=True)   # (RG,1)
            den_acc[...] += jnp.sum(xt + yt, axis=1, keepdims=True)   # (RG,1)

        if not ragged:
            accum(x_ref[...].astype(jnp.float32),
                  y_ref[...].astype(jnp.float32))
        else:
            @pl.when(s < last)                    # steady-state: no mask cost
            def _steady():
                accum(x_ref[...].astype(jnp.float32),
                      y_ref[...].astype(jnp.float32))

            @pl.when(s == last)                   # ragged tail only
            def _tail():
                xt = x_ref[...].astype(jnp.float32)
                yt = y_ref[...].astype(jnp.float32)
                lane = jax.lax.broadcasted_iota(jnp.int32, (RG, TS), 1)
                valid = (s * TS + lane) < SP
                # masked lanes: x=0, y=0 -> p=1 -> log 1 = 0; zero dice sums.
                accum(jnp.where(valid, xt, 0.0), jnp.where(valid, yt, 0.0))

        @pl.when(s == last)
        def _finalize():
            log_out[...] = log_acc[...]
            int_out[...] = int_acc[...]
            den_out[...] = den_acc[...]

    part_shape = jax.ShapeDtypeStruct((P, RG, 1), jnp.float32)
    part_spec = pl.BlockSpec((None, RG, 1), lambda p, s: (p, 0, 0))
    in_spec = pl.BlockSpec((RG, TS), lambda p, s: (p, s))

    log_p, int_p, den_p = pl.pallas_call(
        kernel,
        out_shape=(part_shape, part_shape, part_shape),
        grid=(P, num_tiles),
        in_specs=[in_spec, in_spec],
        out_specs=(part_spec, part_spec, part_spec),
        scratch_shapes=[pltpu.VMEM((RG, 1), jnp.float32)] * 3,
        compiler_params=pltpu.CompilerParams(
            dimension_semantics=("parallel", "arbitrary"),
            vmem_limit_bytes=vmem_limit,
        ),
        cost_estimate=pl.CostEstimate(
            flops=10 * BC * S,
            transcendentals=BC * S,
            bytes_accessed=BC * S * (x_bytes + y_bytes),
        ),
    )(x, y)

    # ---- tiny finalize in plain JAX (negligible cost) ----------------------
    bce = -jnp.sum(log_p) / float(BC * S)                         # mean BCE
    int_bc = jnp.sum(int_p.reshape(BC, k), axis=1)                # per (b,c)
    den_bc = jnp.sum(den_p.reshape(BC, k), axis=1)                # per (b,c)
    dc = (2.0 * int_bc + SMOOTH) / jnp.maximum(den_bc + SMOOTH, 1e-8)
    dice_loss = -jnp.mean(dc)
    return WEIGHT_CE * bce + WEIGHT_DICE * dice_loss


def _reference_loss(net_output, target):
    """Pure-JAX reference (same math, f32) for a sanity check."""
    B, C, H, W = net_output.shape
    x = net_output.reshape(B * C, H * W).astype(jnp.float32)
    y = target.reshape(B * C, H * W).astype(jnp.float32)
    log_x = jnp.maximum(jnp.log(x), -100.0)
    log_1mx = jnp.maximum(jnp.log(1.0 - x), -100.0)
    bce = jnp.mean(-(y * log_x + (1.0 - y) * log_1mx))
    intersect = jnp.sum(x * y, axis=1)
    sum_pred = jnp.sum(x, axis=1)
    sum_gt = jnp.sum(y, axis=1)
    dc = (2.0 * intersect + SMOOTH) / jnp.maximum(sum_pred + sum_gt + SMOOTH, 1e-8)
    dice_loss = -jnp.mean(dc)
    return WEIGHT_CE * bce + WEIGHT_DICE * dice_loss


if __name__ == "__main__":
    key = jax.random.PRNGKey(0)
    k1, k2 = jax.random.split(key)
    B, C, H, W = 2, 4, 16, 16

    # net_output must already be probabilities (the module uses nn.BCELoss,
    # not BCEWithLogits).  bf16 inputs: the kernel is HBM-bound, so narrow
    # dtypes halve traffic; accumulation happens in f32 inside the kernel.
    logits = jax.random.normal(k1, (B, C, H, W), dtype=jnp.float32)
    net_output = jax.nn.sigmoid(logits).astype(jnp.bfloat16)
    target = (jax.random.uniform(k2, (B, C, H, W)) > 0.5).astype(jnp.bfloat16)

    loss = bce_and_dice_loss(net_output, target)
    jax.block_until_ready(loss)

    ref = _reference_loss(net_output, target)
    assert jnp.allclose(loss, ref, rtol=1e-4, atol=1e-5), (loss, ref)

    print("KERNEL_OK")
</pallas_src>

<mosaic_0001>
module attributes {stable_mosaic.version = 11 : i64} {
  func.func @kernel(%arg0: i32, %arg1: i32, %arg2: memref<16x128xbf16, #tpu.memory_space<vmem>>, %arg3: memref<16x128xbf16, #tpu.memory_space<vmem>>, %arg4: memref<1x16x1xf32, #tpu.memory_space<vmem>>, %arg5: memref<1x16x1xf32, #tpu.memory_space<vmem>>, %arg6: memref<1x16x1xf32, #tpu.memory_space<vmem>>, %arg7: memref<16x1xf32, #tpu.memory_space<vmem>>, %arg8: memref<16x1xf32, #tpu.memory_space<vmem>>, %arg9: memref<16x1xf32, #tpu.memory_space<vmem>>) attributes {dimension_semantics = [#tpu.dimension_semantics<parallel>, #tpu.dimension_semantics<arbitrary>], iteration_bounds = array<i64: 1, 1>, scalar_prefetch = 0 : i64, scratch_operands = 3 : i64, tpu.core_type = #tpu.core_type<tc>, window_params = [{transform_indices = @transform_0, window_bounds = array<i64: 16, 128>}, {transform_indices = @transform_1, window_bounds = array<i64: 16, 128>}, {transform_indices = @transform_2, window_bounds = array<i64: 1, 16, 1>}, {transform_indices = @transform_3, window_bounds = array<i64: 1, 16, 1>}, {transform_indices = @transform_4, window_bounds = array<i64: 1, 16, 1>}]} {
    %c0_i32 = arith.constant 0 : i32
    %0 = arith.cmpi eq, %arg1, %c0_i32 : i32
    %1 = arith.extui %0 : i1 to i32
    %c0_i32_0 = arith.constant 0 : i32
    %2 = arith.cmpi ne, %1, %c0_i32_0 : i32
    scf.if %2 {
      %cst_23 = arith.constant 0.000000e+00 : f32
      %35 = vector.broadcast %cst_23 : f32 to vector<16x1xf32>
      %c0_24 = arith.constant 0 : index
      %c0_25 = arith.constant 0 : index
      %36 = vector.load %arg7[%c0_24, %c0_25] : memref<16x1xf32, #tpu.memory_space<vmem>>, vector<16x1xf32>
      tpu.vector_store %arg7[%c0_24, %c0_25], %35 {strides = array<i32>} : memref<16x1xf32, #tpu.memory_space<vmem>>, vector<16x1xf32>,
      %cst_26 = arith.constant 0.000000e+00 : f32
      %37 = vector.broadcast %cst_26 : f32 to vector<16x1xf32>
      %c0_27 = arith.constant 0 : index
      %c0_28 = arith.constant 0 : index
      %38 = vector.load %arg8[%c0_27, %c0_28] : memref<16x1xf32, #tpu.memory_space<vmem>>, vector<16x1xf32>
      tpu.vector_store %arg8[%c0_27, %c0_28], %37 {strides = array<i32>} : memref<16x1xf32, #tpu.memory_space<vmem>>, vector<16x1xf32>,
      %cst_29 = arith.constant 0.000000e+00 : f32
      %39 = vector.broadcast %cst_29 : f32 to vector<16x1xf32>
      %c0_30 = arith.constant 0 : index
      %c0_31 = arith.constant 0 : index
      %40 = vector.load %arg9[%c0_30, %c0_31] : memref<16x1xf32, #tpu.memory_space<vmem>>, vector<16x1xf32>
      tpu.vector_store %arg9[%c0_30, %c0_31], %39 {strides = array<i32>} : memref<16x1xf32, #tpu.memory_space<vmem>>, vector<16x1xf32>,
    } else {
    }
    %c0 = arith.constant 0 : index
    %c0_1 = arith.constant 0 : index
    %3 = vector.load %arg2[%c0, %c0_1] : memref<16x128xbf16, #tpu.memory_space<vmem>>, vector<16x128xbf16>
    %4 = arith.extf %3 : vector<16x128xbf16> to vector<16x128xf32>
    %c0_2 = arith.constant 0 : index
    %c0_3 = arith.constant 0 : index
    %5 = vector.load %arg3[%c0_2, %c0_3] : memref<16x128xbf16, #tpu.memory_space<vmem>>, vector<16x128xbf16>
    %6 = arith.extf %5 : vector<16x128xbf16> to vector<16x128xf32>
    %cst = arith.constant 5.000000e-01 : f32
    %7 = vector.broadcast %cst : f32 to vector<16x128xf32>
    %8 = arith.cmpf ogt, %6, %7 : vector<16x128xf32>
    %cst_4 = arith.constant 1.000000e+00 : f32
    %9 = vector.broadcast %cst_4 : f32 to vector<16x128xf32>
    %10 = arith.subf %9, %4 : vector<16x128xf32>
    %11 = arith.select %8, %4, %10 : vector<16x128xi1>, vector<16x128xf32>
    %12 = math.log %11 : vector<16x128xf32>
    %cst_5 = arith.constant -1.000000e+02 : f32
    %13 = vector.broadcast %cst_5 : f32 to vector<16x128xf32>
    %14 = arith.maximumf %12, %13 : vector<16x128xf32>
    %c0_6 = arith.constant 0 : index
    %c0_7 = arith.constant 0 : index
    %15 = vector.load %arg7[%c0_6, %c0_7] : memref<16x1xf32, #tpu.memory_space<vmem>>, vector<16x1xf32>
    %cst_8 = arith.constant dense<0.000000e+00> : vector<16xf32>
    %16 = vector.multi_reduction <add>, %14, %cst_8 [1] : vector<16x128xf32> to vector<16xf32>
    %17 = vector.shape_cast %16 : vector<16xf32> to vector<16x1xf32>
    %18 = arith.addf %15, %17 : vector<16x1xf32>
    %c0_9 = arith.constant 0 : index
    %c0_10 = arith.constant 0 : index
    %19 = vector.load %arg7[%c0_9, %c0_10] : memref<16x1xf32, #tpu.memory_space<vmem>>, vector<16x1xf32>
    tpu.vector_store %arg7[%c0_9, %c0_10], %18 {strides = array<i32>} : memref<16x1xf32, #tpu.memory_space<vmem>>, vector<16x1xf32>,
    %c0_11 = arith.constant 0 : index
    %c0_12 = arith.constant 0 : index
    %20 = vector.load %arg8[%c0_11, %c0_12] : memref<16x1xf32, #tpu.memory_space<vmem>>, vector<16x1xf32>
    %21 = arith.mulf %4, %6 : vector<16x128xf32>
    %cst_13 = arith.constant dense<0.000000e+00> : vector<16xf32>
    %22 = vector.multi_reduction <add>, %21, %cst_13 [1] : vector<16x128xf32> to vector<16xf32>
    %23 = vector.shape_cast %22 : vector<16xf32> to vector<16x1xf32>
    %24 = arith.addf %20, %23 : vector<16x1xf32>
    %c0_14 = arith.constant 0 : index
    %c0_15 = arith.constant 0 : index
    %25 = vector.load %arg8[%c0_14, %c0_15] : memref<16x1xf32, #tpu.memory_space<vmem>>, vector<16x1xf32>
    tpu.vector_store %arg8[%c0_14, %c0_15], %24 {strides = array<i32>} : memref<16x1xf32, #tpu.memory_space<vmem>>, vector<16x1xf32>,
    %c0_16 = arith.constant 0 : index
    %c0_17 = arith.constant 0 : index
    %26 = vector.load %arg9[%c0_16, %c0_17] : memref<16x1xf32, #tpu.memory_space<vmem>>, vector<16x1xf32>
    %27 = arith.addf %4, %6 : vector<16x128xf32>
    %cst_18 = arith.constant dense<0.000000e+00> : vector<16xf32>
    %28 = vector.multi_reduction <add>, %27, %cst_18 [1] : vector<16x128xf32> to vector<16xf32>
    %29 = vector.shape_cast %28 : vector<16xf32> to vector<16x1xf32>
    %30 = arith.addf %26, %29 : vector<16x1xf32>
    %c0_19 = arith.constant 0 : index
    %c0_20 = arith.constant 0 : index
    %31 = vector.load %arg9[%c0_19, %c0_20] : memref<16x1xf32, #tpu.memory_space<vmem>>, vector<16x1xf32>
    tpu.vector_store %arg9[%c0_19, %c0_20], %30 {strides = array<i32>} : memref<16x1xf32, #tpu.memory_space<vmem>>, vector<16x1xf32>,
    %c0_i32_21 = arith.constant 0 : i32
    %32 = arith.cmpi eq, %arg1, %c0_i32_21 : i32
    %33 = arith.extui %32 : i1 to i32
    %c0_i32_22 = arith.constant 0 : i32
    %34 = arith.cmpi ne, %33, %c0_i32_22 : i32
    scf.if %34 {
      %c0_23 = arith.constant 0 : index
      %c0_24 = arith.constant 0 : index
      %35 = vector.load %arg7[%c0_23, %c0_24] : memref<16x1xf32, #tpu.memory_space<vmem>>, vector<16x1xf32>
      %c0_25 = arith.constant 0 : index
      %c0_26 = arith.constant 0 : index
      %c0_27 = arith.constant 0 : index
      %36 = vector.load %arg4[%c0_25, %c0_26, %c0_27] : memref<1x16x1xf32, #tpu.memory_space<vmem>>, vector<1x16x1xf32>
      %37 = vector.shape_cast %36 : vector<1x16x1xf32> to vector<16x1xf32>
      %38 = vector.shape_cast %35 : vector<16x1xf32> to vector<1x16x1xf32>
      tpu.vector_store %arg4[%c0_25, %c0_26, %c0_27], %38 {strides = array<i32>} : memref<1x16x1xf32, #tpu.memory_space<vmem>>, vector<1x16x1xf32>,
      %c0_28 = arith.constant 0 : index
      %c0_29 = arith.constant 0 : index
      %39 = vector.load %arg8[%c0_28, %c0_29] : memref<16x1xf32, #tpu.memory_space<vmem>>, vector<16x1xf32>
      %c0_30 = arith.constant 0 : index
      %c0_31 = arith.constant 0 : index
      %c0_32 = arith.constant 0 : index
      %40 = vector.load %arg5[%c0_30, %c0_31, %c0_32] : memref<1x16x1xf32, #tpu.memory_space<vmem>>, vector<1x16x1xf32>
      %41 = vector.shape_cast %40 : vector<1x16x1xf32> to vector<16x1xf32>
      %42 = vector.shape_cast %39 : vector<16x1xf32> to vector<1x16x1xf32>
      tpu.vector_store %arg5[%c0_30, %c0_31, %c0_32], %42 {strides = array<i32>} : memref<1x16x1xf32, #tpu.memory_space<vmem>>, vector<1x16x1xf32>,
      %c0_33 = arith.constant 0 : index
      %c0_34 = arith.constant 0 : index
      %43 = vector.load %arg9[%c0_33, %c0_34] : memref<16x1xf32, #tpu.memory_space<vmem>>, vector<16x1xf32>
      %c0_35 = arith.constant 0 : index
      %c0_36 = arith.constant 0 : index
      %c0_37 = arith.constant 0 : index
      %44 = vector.load %arg6[%c0_35, %c0_36, %c0_37] : memref<1x16x1xf32, #tpu.memory_space<vmem>>, vector<1x16x1xf32>
      %45 = vector.shape_cast %44 : vector<1x16x1xf32> to vector<16x1xf32>
      %46 = vector.shape_cast %43 : vector<16x1xf32> to vector<1x16x1xf32>
      tpu.vector_store %arg6[%c0_35, %c0_36, %c0_37], %46 {strides = array<i32>} : memref<1x16x1xf32, #tpu.memory_space<vmem>>, vector<1x16x1xf32>,
    } else {
    }
    return
  }
  func.func @transform_0(%arg0: i32, %arg1: i32) -> (i32, i32) {
    %c0_i32 = arith.constant 0 : i32
    return %arg0, %arg1 : i32, i32
  }
  func.func @transform_1(%arg0: i32, %arg1: i32) -> (i32, i32) {
    %c0_i32 = arith.constant 0 : i32
    return %arg0, %arg1 : i32, i32
  }
  func.func @transform_2(%arg0: i32, %arg1: i32) -> (i32, i32, i32) {
    %c0_i32 = arith.constant 0 : i32
    %c0_i32_0 = arith.constant 0 : i32
    %c0_i32_1 = arith.constant 0 : i32
    return %arg0, %c0_i32, %c0_i32_0 : i32, i32, i32
  }
  func.func @transform_3(%arg0: i32, %arg1: i32) -> (i32, i32, i32) {
    %c0_i32 = arith.constant 0 : i32
    %c0_i32_0 = arith.constant 0 : i32
    %c0_i32_1 = arith.constant 0 : i32
    return %arg0, %c0_i32, %c0_i32_0 : i32, i32, i32
  }
  func.func @transform_4(%arg0: i32, %arg1: i32) -> (i32, i32, i32) {
    %c0_i32 = arith.constant 0 : i32
    %c0_i32_0 = arith.constant 0 : i32
    %c0_i32_1 = arith.constant 0 : i32
    return %arg0, %c0_i32, %c0_i32_0 : i32, i32, i32
  }
}

</mosaic_0001>

<bundles_post_ra>
// kernel: tpu_custom_call.1
= control target key start
LH: loop header
LB: loop body
LE: loop exit
PB: predicated region body
PF: predicated region fallthrough
CT: control target
= control target key end

     0   :  { %10 = vsyncpa [#allocation6], 0  ;;  %s282_s0 = inlined_call_operand.hbm [shape: bf16[16,128], index: 0, kind: input, shape index: {}]   ;;  %s283_s1 = inlined_call_operand.hbm [shape: bf16[16,128], index: 1, kind: input, shape index: {}]   ;;  %s284_s2 = inlined_call_operand.vmem [shape: f32[1,16,1], index: 2, kind: output, shape index: {0}]   ;;  %s285_s3 = inlined_call_operand.vmem [shape: f32[1,16,1], index: 3, kind: output, shape index: {1}]   ;;  %s286_s4 = inlined_call_operand.vmem [shape: f32[1,16,1], index: 4, kind: output, shape index: {2}]  }
   0x1   :  { %s16_s17 = sshll.u32 %s282_s0, 4  ;;  %s17_s17 = int_to_ptr.hbm [resolvable:$true] %s16_s17 }
   0x2   :  { %11 = vsyncpa [#allocation8], 0  ;;  %s210_s18 = smov [#allocation5]   ;;  %s29_s22 = sshll.u32 %s283_s1, 4  ;;  %s30_s22 = int_to_ptr.hbm [resolvable:$true] %s29_s22 }
   0x3   :  { %s18_s19 = sshll.u32 %s210_s18, 4  ;;  %s211_s23 = smov 64   ;;  %s19_s19 = int_to_ptr.vmem [resolvable:$true] %s18_s19 }
   0x4   :  { %s212_s24 = smov 4   ;;  %s213_s25 = smov [#allocation7]  }
   0x5   :  { %24 = dma.hbm_to_vmem [thread:$0]  %s17_s17, 128, %s19_s19, [#allocation6], %s211_s23, %s211_s23, %s212_s24  }
   0x6   :  { %s31_s26 = sshll.u32 %s213_s25, 4  ;;  %s32_s26 = int_to_ptr.vmem [resolvable:$true] %s31_s26 }
   0x7   :  { %37 = dma.hbm_to_vmem [thread:$0]  %s30_s22, 128, %s32_s26, [#allocation8], %s211_s23, %s211_s23, %s212_s24  }
   0x8   :  { %206 = dma.done.wait [#allocation6], 128  }
   0x9   :  { %207 = vsyncadd [#allocation6], 4294967168 }
   0xa   :  { %208 = dma.done.wait [#allocation8], 128  }
   0xb   :  { %209 = vsyncadd [#allocation8], 4294967168  ;;  %vm50_vm0 = vcmask 7168   ;;  %v214_v0 = vmov 0.0   ;;  %v142_v1 = vld [vmem:[#allocation5] sm:$0xff]   ;;  %v146_v2 = vld [vmem:[#allocation7] sm:$0xff]  }
   0xc   :  { %55 = vst.msk [vmem:[#allocation4] sm:$0xff] %vm50_vm0, %v214_v0  ;;  %v143_v3 = vunpack.c.l.bf16 %v142_v1  ;;  %v147_v4 = vunpack.c.l.bf16 %v146_v2  ;;  %v144_v5 = vunpack.c.h.bf16 %v142_v1  ;;  %v148_v6 = vunpack.c.h.bf16 %v146_v2 }
   0xd   :  { %51 = vst.msk [vmem:[#allocation2] sm:$0xff] %vm50_vm0, %v214_v0 }
   0xe   :  { %52 = vst.msk [vmem:[#allocation2 + $0x8] sm:$0xff] %vm50_vm0, %v214_v0  ;;  %v102_v7 = vadd.f32 %v147_v4, %v143_v3  ;;  %v90_v8 = vmul.f32 %v147_v4, %v143_v3  ;;  %vm65_vm1 = vcmp.gt.f32.partialorder %v147_v4, 0.5  ;;  %v67_v9 = vsub.f32 1.0, %v143_v3 }
   0xf   :  { %53 = vst.msk [vmem:[#allocation3] sm:$0xff] %vm50_vm0, %v214_v0  ;;  %vm66_vm2 = vcmp.gt.f32.partialorder %v148_v6, 0.5  ;;  %v68_v10 = vsub.f32 1.0, %v144_v5  ;;  %v103_v13 = vadd.f32 %v148_v6, %v144_v5  ;;  %v91_v14 = vmul.f32 %v148_v6, %v144_v5 }
  0x10   :  { %54 = vst.msk [vmem:[#allocation3 + $0x8] sm:$0xff] %vm50_vm0, %v214_v0  ;;  %104 = vadd.xlane.f32.xlu2 %v102_v7  ;;  %92 = vadd.xlane.f32.xlu1 %v90_v8  ;;  %v69_v11 = vsel %vm65_vm1, %v143_v3, %v67_v9 }
  0x11   :  { %56 = vst.msk [vmem:[#allocation4 + $0x8] sm:$0xff] %vm50_vm0, %v214_v0  ;;  %154 = vlog2.f32 %v69_v11  ;;  %v70_v12 = vsel %vm66_vm2, %v144_v5, %v68_v10 }
  0x12   :  { %156 = vlog2.f32 %v70_v12 }
  0x13   :  { %v100_v21 = vld [vmem:[#allocation4] sm:$0xff] }
  0x14   :  { %v77_v33 = vld [vmem:[#allocation2] sm:$0xff] }
  0x15   :  { %v78_v38 = vld [vmem:[#allocation2 + $0x8] sm:$0xff] }
  0x16   :  { %v88_v22 = vld [vmem:[#allocation3] sm:$0xff] }
  0x17   :  { %v155_v15 = vpop.eup %154  ;;  %v89_v28 = vld [vmem:[#allocation3 + $0x8] sm:$0xff] }
  0x18   :  { %v72_v16 = vmul.f32 0.6931472, %v155_v15  ;;  %106 = vadd.xlane.f32.xlu2 %v103_v13  ;;  %94 = vadd.xlane.f32.xlu1 %v91_v14  ;;  %v157_v17 = vpop.eup %156  ;;  %v101_v27 = vld [vmem:[#allocation4 + $0x8] sm:$0xff] }
  0x19   :  { %v74_v19 = vmul.f32 0.6931472, %v157_v17 }
  0x1a   :  { %v75_v18 = vmax.f32 %v72_v16, -100.0 }
  0x1b   :  { %v76_v20 = vmax.f32 %v74_v19, -100.0 }
  0x1c   :  { %79 = vadd.xlane.f32.xlu0 %v75_v18 }
  0x24   :  { %81 = vadd.xlane.f32.xlu0 %v76_v20 }
  0x83   :  { %v105_v23 = vpop.xlane.xlu2 %104  ;;  %v93_v24 = vpop.xlane.xlu1 %92 }
  0x84   :  { %v108_v25 = vadd.f32 %v105_v23, %v100_v21  ;;  %v96_v26 = vadd.f32 %v93_v24, %v88_v22 }
  0x86   :  { %110 = vst.msk [vmem:[#allocation4] sm:$0xff] %vm50_vm0, %v108_v25 }
  0x87   :  { %98 = vst.msk [vmem:[#allocation3] sm:$0xff] %vm50_vm0, %v96_v26 }
  0x8b   :  { %v107_v29 = vpop.xlane.xlu2 %106  ;;  %v95_v30 = vpop.xlane.xlu1 %94 }
  0x8c   :  { %v109_v31 = vadd.f32 %v107_v29, %v101_v27  ;;  %v97_v34 = vadd.f32 %v95_v30, %v89_v28 }
  0x8d   :  { %v123_v32 = vld [vmem:[#allocation4] sm:$0xff] }
  0x8e   :  { %125 = vst.msk [vmem:[%s286_s4] sm:$0xff] %vm50_vm0, %v123_v32  ;;  %v119_v35 = vld [vmem:[#allocation3] sm:$0xff] }
  0x8f   :  { %121 = vst.msk [vmem:[%s285_s3] sm:$0xff] %vm50_vm0, %v119_v35  ;;  %v80_v36 = vpop.xlane.xlu0 %79 }
  0x90   :  { %v83_v37 = vadd.f32 %v80_v36, %v77_v33  ;;  %111 = vst.msk [vmem:[#allocation4 + $0x8] sm:$0xff] %vm50_vm0, %v109_v31 }
  0x91   :  { %99 = vst.msk [vmem:[#allocation3 + $0x8] sm:$0xff] %vm50_vm0, %v97_v34 }
  0x92   :  { %86 = vst.msk [vmem:[#allocation2] sm:$0xff] %vm50_vm0, %v83_v37 }
  0x97   :  { %v124_v39 = vld [vmem:[#allocation4 + $0x8] sm:$0xff]  ;;  %v82_v40 = vpop.xlane.xlu0 %81 }
  0x98   :  { %126 = vst.msk [vmem:[%s286_s4 + $0x8] sm:$0xff] %vm50_vm0, %v124_v39  ;;  %v120_v41 = vld [vmem:[#allocation3 + $0x8] sm:$0xff]  ;;  %v84_v42 = vadd.f32 %v82_v40, %v78_v38 }
  0x99   :  { %v115_v43 = vld [vmem:[#allocation2] sm:$0xff]  ;;  %122 = vst.msk [vmem:[%s285_s3 + $0x8] sm:$0xff] %vm50_vm0, %v120_v41 }
  0x9a   :  { %117 = vst.msk [vmem:[%s284_s2] sm:$0xff] %vm50_vm0, %v115_v43 }
  0x9b   :  { %87 = vst.msk [vmem:[#allocation2 + $0x8] sm:$0xff] %vm50_vm0, %v84_v42 }
  0xa2   :  { %v116_v44 = vld [vmem:[#allocation2 + $0x8] sm:$0xff] }
  0xa3   :  { %118 = vst.msk [vmem:[%s284_s2 + $0x8] sm:$0xff] %vm50_vm0, %v116_v44 }
  0xa4   :  { %139 = vsyncpa [#allocation6], 1 }
  0xa5   :  { %140 = vsyncpa [#allocation8], 1 }

</bundles_post_ra>
